<compile_context>
chip_gen: v7x
topology: tpu7x:2x2x1
jax: 0.10.0
libtpu: 0.0.40
codegen_flags: <defaults>
</compile_context>

<pallas_src>
import functools

import jax
import jax.numpy as jnp
from jax.experimental import pallas as pl
from jax.experimental.pallas import tpu as pltpu


def _lstm_fc_kernel(scaler_ref, x1_ref, wih_ref, whh_ref, b_ref,
                    wcomb_ref, bcomb_ref, wbig_ref, bbig_ref, out_ref,
                    *, seq_len, future, hidden):
    H = hidden
    scaler = scaler_ref[0, 0]

    # Normalized warm-up input (reproduces `input = input / scaler; input[:, 1]`).
    x1 = x1_ref[...] / scaler                        # (Bp, I)

    whh_t = whh_ref[...]                             # (H, 4H)
    w_comb = wcomb_ref[...]                          # (H, 4H) = Whh^T + Wlin^T @ Wih^T
    b_comb = bcomb_ref[...]                          # (1, 4H) = b + blin @ Wih^T

    # Hoisted loop-invariant input contribution: every warm-up step sees the
    # same x[:, 1], so fold x1 @ Wih^T into the bias once.
    b_warm = (jnp.dot(x1, wih_ref[...], preferred_element_type=jnp.float32)
              + b_ref[...])                          # (Bp, 4H)

    Bp = x1.shape[0]
    h = jnp.zeros((Bp, H), jnp.float32)
    c = jnp.zeros((Bp, H), jnp.float32)

    def apply_gates(gates, c_prev):
        # Two full-(B,4H) EUP activations instead of four width-H ones.
        sig = jax.nn.sigmoid(gates)
        tnh = jnp.tanh(gates)
        i_g = sig[:, 0 * H:1 * H]
        f_g = sig[:, 1 * H:2 * H]
        g_g = tnh[:, 2 * H:3 * H]
        o_g = sig[:, 3 * H:4 * H]
        c_new = f_g * c_prev + i_g * g_g
        h_new = o_g * jnp.tanh(c_new)
        return h_new, c_new

    # Warm-up recurrence: fully unrolled (seq_len is small & static); h/c are
    # vreg-resident carries; one matmul per step.
    for _ in range(seq_len):
        gates = jnp.dot(h, whh_t, preferred_element_type=jnp.float32) + b_warm
        h, c = apply_gates(gates, c)

    # Autoregressive future loop with the feedback fused into the hidden
    # matmul, so nothing besides the recurrence itself sits on the serial path.
    hs = []
    for _ in range(future):
        gates = jnp.dot(h, w_comb, preferred_element_type=jnp.float32) + b_comb
        h, c = apply_gates(gates, c)
        hs.append(h)

    # Bulk output projection: concatenate hidden states along lanes and apply
    # the block-diagonal Wlin once, then a single lane-dense store + rescale.
    h_all = jnp.concatenate(hs, axis=1)              # (Bp, future*H)
    out_all = (jnp.dot(h_all, wbig_ref[...], preferred_element_type=jnp.float32)
               + bbig_ref[...])                      # (Bp, future*O)
    out_ref[...] = out_all * scaler


def lstm_fc_forward(x, wih, whh, b_ih, b_hh, wlin, blin, future):
    B, S, I = x.shape
    H = whh.shape[1]
    O = wlin.shape[0]
    assert I == O, "autoregressive feedback requires output_size == input_size"
    assert S >= 2, "forward reads input[:, 1]"
    assert future >= 1

    # Pad batch to the native 8-sublane tile.
    Bp = ((B + 7) // 8) * 8

    x = jnp.asarray(x, jnp.float32)
    scaler = jnp.max(x).reshape(1, 1)                           # (1,1) SMEM scalar
    x1 = jnp.zeros((Bp, I), jnp.float32).at[:B].set(x[:, 1, :])  # only the used slice

    wih_t = jnp.asarray(wih.T, jnp.float32)                     # (I, 4H)
    whh_t = jnp.asarray(whh.T, jnp.float32)                     # (H, 4H)
    b = jnp.asarray((b_ih + b_hh)[None, :], jnp.float32)        # (1, 4H)
    wlin_t = jnp.asarray(wlin.T, jnp.float32)                   # (H, O)
    blin2 = jnp.asarray(blin[None, :], jnp.float32)             # (1, O)

    # Feedback fusion (exact algebra):
    #   gates_t = out_{t-1}@Wih^T + h_{t-1}@Whh^T + b
    #           = h_{t-1}@(Whh^T + Wlin^T@Wih^T) + (b + blin@Wih^T)
    w_comb = whh_t + wlin_t @ wih_t                             # (H, 4H)
    b_comb = b + blin2 @ wih_t                                  # (1, 4H)

    # Block-diagonal output projection for one bulk matmul over all future h's.
    w_big = jnp.kron(jnp.eye(future, dtype=jnp.float32), wlin_t)  # (future*H, future*O)
    b_big = jnp.tile(blin2, (1, future))                          # (1, future*O)

    kernel = functools.partial(_lstm_fc_kernel, seq_len=S, future=future, hidden=H)

    out = pl.pallas_call(
        kernel,
        out_shape=jax.ShapeDtypeStruct((Bp, future * O), jnp.float32),
        grid=(1,),
        in_specs=[
            pl.BlockSpec(memory_space=pltpu.MemorySpace.SMEM),         # scaler (1,1)
            pl.BlockSpec((Bp, I), lambda i: (0, 0)),                   # x[:, 1] (padded)
            pl.BlockSpec((I, 4 * H), lambda i: (0, 0)),                # Wih^T
            pl.BlockSpec((H, 4 * H), lambda i: (0, 0)),                # Whh^T
            pl.BlockSpec((1, 4 * H), lambda i: (0, 0)),                # b_ih + b_hh
            pl.BlockSpec((H, 4 * H), lambda i: (0, 0)),                # W_comb
            pl.BlockSpec((1, 4 * H), lambda i: (0, 0)),                # b_comb
            pl.BlockSpec((future * H, future * O), lambda i: (0, 0)),  # W_big
            pl.BlockSpec((1, future * O), lambda i: (0, 0)),           # b_big
        ],
        out_specs=pl.BlockSpec((Bp, future * O), lambda i: (0, 0)),
    )(scaler, x1, wih_t, whh_t, b, w_comb, b_comb, w_big, b_big)

    out = out[:B].reshape(B, future, O)                         # drop batch padding
    if O == 1:                                                  # torch .squeeze(2)
        out = out[:, :, 0]
    return out


def lstm_fc_reference(x, wih, whh, b_ih, b_hh, wlin, blin, future):
    """Pure-JAX reference mirroring the PyTorch forward exactly."""
    scaler = jnp.max(x)
    xn = x / scaler
    B = x.shape[0]
    H = whh.shape[1]
    h = jnp.zeros((B, H), jnp.float32)
    c = jnp.zeros((B, H), jnp.float32)

    def cell(inp, h, c):
        gates = inp @ wih.T + b_ih + h @ whh.T + b_hh
        i, f, g, o = jnp.split(gates, 4, axis=1)
        i = jax.nn.sigmoid(i)
        f = jax.nn.sigmoid(f)
        g = jnp.tanh(g)
        o = jax.nn.sigmoid(o)
        c = f * c + i * g
        h = o * jnp.tanh(c)
        return h, c

    out = None
    for _ in range(x.shape[1]):
        h, c = cell(xn[:, 1], h, c)
        out = h @ wlin.T + blin
    outs = []
    for _ in range(future):
        h, c = cell(out, h, c)
        out = h @ wlin.T + blin
        outs.append(out)
    outs = jnp.stack(outs, axis=1)
    if outs.shape[2] == 1:
        outs = outs[:, :, 0]
    return outs * scaler


if __name__ == "__main__":
    # Small shapes consistent with the forecaster: autoregressive feedback
    # forces input_size == output_size (canonically 1).
    B, S, I, H, O = 2, 8, 1, 32, 1
    FUTURE = 4

    key = jax.random.PRNGKey(0)
    ks = jax.random.split(key, 7)
    bound = 1.0 / jnp.sqrt(H)

    x = jax.random.uniform(ks[0], (B, S, I), jnp.float32, 0.1, 2.0)
    wih = jax.random.uniform(ks[1], (4 * H, I), jnp.float32, -bound, bound)
    whh = jax.random.uniform(ks[2], (4 * H, H), jnp.float32, -bound, bound)
    b_ih = jax.random.uniform(ks[3], (4 * H,), jnp.float32, -bound, bound)
    b_hh = jax.random.uniform(ks[4], (4 * H,), jnp.float32, -bound, bound)
    wlin = jax.random.uniform(ks[5], (O, H), jnp.float32, -bound, bound)
    blin = jax.random.uniform(ks[6], (O,), jnp.float32, -bound, bound)

    out = lstm_fc_forward(x, wih, whh, b_ih, b_hh, wlin, blin, FUTURE)
    out = jax.block_until_ready(out)

    ref = lstm_fc_reference(x, wih, whh, b_ih, b_hh, wlin, blin, FUTURE)
    ref = jax.block_until_ready(ref)

    assert out.shape == (B, FUTURE), out.shape
    assert jnp.allclose(out, ref, rtol=1e-3, atol=1e-4), (out, ref)
    print("KERNEL_OK")
</pallas_src>

<mosaic_0001>
module attributes {stable_mosaic.version = 11 : i64} {
  func.func @_lstm_fc_kernel(%arg0: i32, %arg1: memref<1x1xf32, #tpu.memory_space<smem>>, %arg2: memref<8x1xf32, #tpu.memory_space<vmem>>, %arg3: memref<1x128xf32, #tpu.memory_space<vmem>>, %arg4: memref<32x128xf32, #tpu.memory_space<vmem>>, %arg5: memref<1x128xf32, #tpu.memory_space<vmem>>, %arg6: memref<32x128xf32, #tpu.memory_space<vmem>>, %arg7: memref<1x128xf32, #tpu.memory_space<vmem>>, %arg8: memref<128x4xf32, #tpu.memory_space<vmem>>, %arg9: memref<1x4xf32, #tpu.memory_space<vmem>>, %arg10: memref<8x4xf32, #tpu.memory_space<vmem>>) attributes {dimension_semantics = [#tpu.dimension_semantics<arbitrary>], iteration_bounds = array<i64: 1>, scalar_prefetch = 0 : i64, scratch_operands = 0 : i64, tpu.core_type = #tpu.core_type<tc>, window_params = [{transform_indices = @transform_0, window_bounds = array<i64: 1, 1>}, {pipeline_mode = #tpu.pipeline_mode<synchronous>, transform_indices = @transform_1, window_bounds = array<i64: 8, 1>}, {pipeline_mode = #tpu.pipeline_mode<synchronous>, transform_indices = @transform_2, window_bounds = array<i64: 1, 128>}, {pipeline_mode = #tpu.pipeline_mode<synchronous>, transform_indices = @transform_3, window_bounds = array<i64: 32, 128>}, {pipeline_mode = #tpu.pipeline_mode<synchronous>, transform_indices = @transform_4, window_bounds = array<i64: 1, 128>}, {pipeline_mode = #tpu.pipeline_mode<synchronous>, transform_indices = @transform_5, window_bounds = array<i64: 32, 128>}, {pipeline_mode = #tpu.pipeline_mode<synchronous>, transform_indices = @transform_6, window_bounds = array<i64: 1, 128>}, {pipeline_mode = #tpu.pipeline_mode<synchronous>, transform_indices = @transform_7, window_bounds = array<i64: 128, 4>}, {pipeline_mode = #tpu.pipeline_mode<synchronous>, transform_indices = @transform_8, window_bounds = array<i64: 1, 4>}, {pipeline_mode = #tpu.pipeline_mode<synchronous>, transform_indices = @transform_9, window_bounds = array<i64: 8, 4>}]} {
    %c0 = arith.constant 0 : index
    %c0_0 = arith.constant 0 : index
    %0 = memref.load %arg1[%c0, %c0_0] : memref<1x1xf32, #tpu.memory_space<smem>>
    %c0_1 = arith.constant 0 : index
    %c0_2 = arith.constant 0 : index
    %1 = vector.load %arg2[%c0_1, %c0_2] : memref<8x1xf32, #tpu.memory_space<vmem>>, vector<8x1xf32>
    %2 = vector.broadcast %0 : f32 to vector<8x1xf32>
    %3 = arith.divf %1, %2 : vector<8x1xf32>
    %c0_3 = arith.constant 0 : index
    %c0_4 = arith.constant 0 : index
    %4 = vector.load %arg4[%c0_3, %c0_4] : memref<32x128xf32, #tpu.memory_space<vmem>>, vector<32x128xf32>
    %c0_5 = arith.constant 0 : index
    %c0_6 = arith.constant 0 : index
    %5 = vector.load %arg6[%c0_5, %c0_6] : memref<32x128xf32, #tpu.memory_space<vmem>>, vector<32x128xf32>
    %c0_7 = arith.constant 0 : index
    %c0_8 = arith.constant 0 : index
    %6 = vector.load %arg7[%c0_7, %c0_8] : memref<1x128xf32, #tpu.memory_space<vmem>>, vector<1x128xf32>
    %c0_9 = arith.constant 0 : index
    %c0_10 = arith.constant 0 : index
    %7 = vector.load %arg3[%c0_9, %c0_10] : memref<1x128xf32, #tpu.memory_space<vmem>>, vector<1x128xf32>
    %cst = arith.constant dense<0.000000e+00> : vector<8x128xf32>
    %8 = tpu.matmul %3, %7, %cst {dimension_numbers = #tpu.dot_dimension_numbers<[1], [0], [0], [1], [0, 0, 1, 1], [], []>} : vector<8x1xf32>, vector<1x128xf32>, vector<8x128xf32> -> vector<8x128xf32>
    %c0_11 = arith.constant 0 : index
    %c0_12 = arith.constant 0 : index
    %9 = vector.load %arg5[%c0_11, %c0_12] : memref<1x128xf32, #tpu.memory_space<vmem>>, vector<1x128xf32>
    %10 = vector.broadcast %9 : vector<1x128xf32> to vector<8x128xf32>
    %11 = arith.addf %8, %10 : vector<8x128xf32>
    %cst_13 = arith.constant 0.000000e+00 : f32
    %12 = vector.broadcast %cst_13 : f32 to vector<8x32xf32>
    %cst_14 = arith.constant 0.000000e+00 : f32
    %13 = vector.broadcast %cst_14 : f32 to vector<8x32xf32>
    %cst_15 = arith.constant dense<0.000000e+00> : vector<8x128xf32>
    %14 = tpu.matmul %12, %4, %cst_15 {dimension_numbers = #tpu.dot_dimension_numbers<[1], [0], [0], [1], [0, 0, 1, 1], [], []>} : vector<8x32xf32>, vector<32x128xf32>, vector<8x128xf32> -> vector<8x128xf32>
    %15 = arith.addf %14, %11 : vector<8x128xf32>
    %16 = arith.negf %15 : vector<8x128xf32>
    %17 = math.exp %16 : vector<8x128xf32>
    %cst_16 = arith.constant 1.000000e+00 : f32
    %18 = vector.broadcast %cst_16 : f32 to vector<8x128xf32>
    %19 = arith.addf %18, %17 : vector<8x128xf32>
    %20 = arith.divf %18, %19 : vector<8x128xf32>
    %21 = math.tanh %15 : vector<8x128xf32>
    %22 = vector.extract_strided_slice %20 {offsets = [0, 0], sizes = [8, 32], strides = [1, 1]} : vector<8x128xf32> to vector<8x32xf32>
    %23 = vector.extract_strided_slice %20 {offsets = [0, 32], sizes = [8, 32], strides = [1, 1]} : vector<8x128xf32> to vector<8x32xf32>
    %24 = vector.extract_strided_slice %21 {offsets = [0, 64], sizes = [8, 32], strides = [1, 1]} : vector<8x128xf32> to vector<8x32xf32>
    %25 = vector.extract_strided_slice %20 {offsets = [0, 96], sizes = [8, 32], strides = [1, 1]} : vector<8x128xf32> to vector<8x32xf32>
    %26 = arith.mulf %23, %13 : vector<8x32xf32>
    %27 = arith.mulf %22, %24 : vector<8x32xf32>
    %28 = arith.addf %26, %27 : vector<8x32xf32>
    %29 = math.tanh %28 : vector<8x32xf32>
    %30 = arith.mulf %25, %29 : vector<8x32xf32>
    %cst_17 = arith.constant dense<0.000000e+00> : vector<8x128xf32>
    %31 = tpu.matmul %30, %4, %cst_17 {dimension_numbers = #tpu.dot_dimension_numbers<[1], [0], [0], [1], [0, 0, 1, 1], [], []>} : vector<8x32xf32>, vector<32x128xf32>, vector<8x128xf32> -> vector<8x128xf32>
    %32 = arith.addf %31, %11 : vector<8x128xf32>
    %33 = arith.negf %32 : vector<8x128xf32>
    %34 = math.exp %33 : vector<8x128xf32>
    %cst_18 = arith.constant 1.000000e+00 : f32
    %35 = vector.broadcast %cst_18 : f32 to vector<8x128xf32>
    %36 = arith.addf %35, %34 : vector<8x128xf32>
    %37 = arith.divf %35, %36 : vector<8x128xf32>
    %38 = math.tanh %32 : vector<8x128xf32>
    %39 = vector.extract_strided_slice %37 {offsets = [0, 0], sizes = [8, 32], strides = [1, 1]} : vector<8x128xf32> to vector<8x32xf32>
    %40 = vector.extract_strided_slice %37 {offsets = [0, 32], sizes = [8, 32], strides = [1, 1]} : vector<8x128xf32> to vector<8x32xf32>
    %41 = vector.extract_strided_slice %38 {offsets = [0, 64], sizes = [8, 32], strides = [1, 1]} : vector<8x128xf32> to vector<8x32xf32>
    %42 = vector.extract_strided_slice %37 {offsets = [0, 96], sizes = [8, 32], strides = [1, 1]} : vector<8x128xf32> to vector<8x32xf32>
    %43 = arith.mulf %40, %28 : vector<8x32xf32>
    %44 = arith.mulf %39, %41 : vector<8x32xf32>
    %45 = arith.addf %43, %44 : vector<8x32xf32>
    %46 = math.tanh %45 : vector<8x32xf32>
    %47 = arith.mulf %42, %46 : vector<8x32xf32>
    %cst_19 = arith.constant dense<0.000000e+00> : vector<8x128xf32>
    %48 = tpu.matmul %47, %4, %cst_19 {dimension_numbers = #tpu.dot_dimension_numbers<[1], [0], [0], [1], [0, 0, 1, 1], [], []>} : vector<8x32xf32>, vector<32x128xf32>, vector<8x128xf32> -> vector<8x128xf32>
    %49 = arith.addf %48, %11 : vector<8x128xf32>
    %50 = arith.negf %49 : vector<8x128xf32>
    %51 = math.exp %50 : vector<8x128xf32>
    %cst_20 = arith.constant 1.000000e+00 : f32
    %52 = vector.broadcast %cst_20 : f32 to vector<8x128xf32>
    %53 = arith.addf %52, %51 : vector<8x128xf32>
    %54 = arith.divf %52, %53 : vector<8x128xf32>
    %55 = math.tanh %49 : vector<8x128xf32>
    %56 = vector.extract_strided_slice %54 {offsets = [0, 0], sizes = [8, 32], strides = [1, 1]} : vector<8x128xf32> to vector<8x32xf32>
    %57 = vector.extract_strided_slice %54 {offsets = [0, 32], sizes = [8, 32], strides = [1, 1]} : vector<8x128xf32> to vector<8x32xf32>
    %58 = vector.extract_strided_slice %55 {offsets = [0, 64], sizes = [8, 32], strides = [1, 1]} : vector<8x128xf32> to vector<8x32xf32>
    %59 = vector.extract_strided_slice %54 {offsets = [0, 96], sizes = [8, 32], strides = [1, 1]} : vector<8x128xf32> to vector<8x32xf32>
    %60 = arith.mulf %57, %45 : vector<8x32xf32>
    %61 = arith.mulf %56, %58 : vector<8x32xf32>
    %62 = arith.addf %60, %61 : vector<8x32xf32>
    %63 = math.tanh %62 : vector<8x32xf32>
    %64 = arith.mulf %59, %63 : vector<8x32xf32>
    %cst_21 = arith.constant dense<0.000000e+00> : vector<8x128xf32>
    %65 = tpu.matmul %64, %4, %cst_21 {dimension_numbers = #tpu.dot_dimension_numbers<[1], [0], [0], [1], [0, 0, 1, 1], [], []>} : vector<8x32xf32>, vector<32x128xf32>, vector<8x128xf32> -> vector<8x128xf32>
    %66 = arith.addf %65, %11 : vector<8x128xf32>
    %67 = arith.negf %66 : vector<8x128xf32>
    %68 = math.exp %67 : vector<8x128xf32>
    %cst_22 = arith.constant 1.000000e+00 : f32
    %69 = vector.broadcast %cst_22 : f32 to vector<8x128xf32>
    %70 = arith.addf %69, %68 : vector<8x128xf32>
    %71 = arith.divf %69, %70 : vector<8x128xf32>
    %72 = math.tanh %66 : vector<8x128xf32>
    %73 = vector.extract_strided_slice %71 {offsets = [0, 0], sizes = [8, 32], strides = [1, 1]} : vector<8x128xf32> to vector<8x32xf32>
    %74 = vector.extract_strided_slice %71 {offsets = [0, 32], sizes = [8, 32], strides = [1, 1]} : vector<8x128xf32> to vector<8x32xf32>
    %75 = vector.extract_strided_slice %72 {offsets = [0, 64], sizes = [8, 32], strides = [1, 1]} : vector<8x128xf32> to vector<8x32xf32>
    %76 = vector.extract_strided_slice %71 {offsets = [0, 96], sizes = [8, 32], strides = [1, 1]} : vector<8x128xf32> to vector<8x32xf32>
    %77 = arith.mulf %74, %62 : vector<8x32xf32>
    %78 = arith.mulf %73, %75 : vector<8x32xf32>
    %79 = arith.addf %77, %78 : vector<8x32xf32>
    %80 = math.tanh %79 : vector<8x32xf32>
    %81 = arith.mulf %76, %80 : vector<8x32xf32>
    %cst_23 = arith.constant dense<0.000000e+00> : vector<8x128xf32>
    %82 = tpu.matmul %81, %4, %cst_23 {dimension_numbers = #tpu.dot_dimension_numbers<[1], [0], [0], [1], [0, 0, 1, 1], [], []>} : vector<8x32xf32>, vector<32x128xf32>, vector<8x128xf32> -> vector<8x128xf32>
    %83 = arith.addf %82, %11 : vector<8x128xf32>
    %84 = arith.negf %83 : vector<8x128xf32>
    %85 = math.exp %84 : vector<8x128xf32>
    %cst_24 = arith.constant 1.000000e+00 : f32
    %86 = vector.broadcast %cst_24 : f32 to vector<8x128xf32>
    %87 = arith.addf %86, %85 : vector<8x128xf32>
    %88 = arith.divf %86, %87 : vector<8x128xf32>
    %89 = math.tanh %83 : vector<8x128xf32>
    %90 = vector.extract_strided_slice %88 {offsets = [0, 0], sizes = [8, 32], strides = [1, 1]} : vector<8x128xf32> to vector<8x32xf32>
    %91 = vector.extract_strided_slice %88 {offsets = [0, 32], sizes = [8, 32], strides = [1, 1]} : vector<8x128xf32> to vector<8x32xf32>
    %92 = vector.extract_strided_slice %89 {offsets = [0, 64], sizes = [8, 32], strides = [1, 1]} : vector<8x128xf32> to vector<8x32xf32>
    %93 = vector.extract_strided_slice %88 {offsets = [0, 96], sizes = [8, 32], strides = [1, 1]} : vector<8x128xf32> to vector<8x32xf32>
    %94 = arith.mulf %91, %79 : vector<8x32xf32>
    %95 = arith.mulf %90, %92 : vector<8x32xf32>
    %96 = arith.addf %94, %95 : vector<8x32xf32>
    %97 = math.tanh %96 : vector<8x32xf32>
    %98 = arith.mulf %93, %97 : vector<8x32xf32>
    %cst_25 = arith.constant dense<0.000000e+00> : vector<8x128xf32>
    %99 = tpu.matmul %98, %4, %cst_25 {dimension_numbers = #tpu.dot_dimension_numbers<[1], [0], [0], [1], [0, 0, 1, 1], [], []>} : vector<8x32xf32>, vector<32x128xf32>, vector<8x128xf32> -> vector<8x128xf32>
    %100 = arith.addf %99, %11 : vector<8x128xf32>
    %101 = arith.negf %100 : vector<8x128xf32>
    %102 = math.exp %101 : vector<8x128xf32>
    %cst_26 = arith.constant 1.000000e+00 : f32
    %103 = vector.broadcast %cst_26 : f32 to vector<8x128xf32>
    %104 = arith.addf %103, %102 : vector<8x128xf32>
    %105 = arith.divf %103, %104 : vector<8x128xf32>
    %106 = math.tanh %100 : vector<8x128xf32>
    %107 = vector.extract_strided_slice %105 {offsets = [0, 0], sizes = [8, 32], strides = [1, 1]} : vector<8x128xf32> to vector<8x32xf32>
    %108 = vector.extract_strided_slice %105 {offsets = [0, 32], sizes = [8, 32], strides = [1, 1]} : vector<8x128xf32> to vector<8x32xf32>
    %109 = vector.extract_strided_slice %106 {offsets = [0, 64], sizes = [8, 32], strides = [1, 1]} : vector<8x128xf32> to vector<8x32xf32>
    %110 = vector.extract_strided_slice %105 {offsets = [0, 96], sizes = [8, 32], strides = [1, 1]} : vector<8x128xf32> to vector<8x32xf32>
    %111 = arith.mulf %108, %96 : vector<8x32xf32>
    %112 = arith.mulf %107, %109 : vector<8x32xf32>
    %113 = arith.addf %111, %112 : vector<8x32xf32>
    %114 = math.tanh %113 : vector<8x32xf32>
    %115 = arith.mulf %110, %114 : vector<8x32xf32>
    %cst_27 = arith.constant dense<0.000000e+00> : vector<8x128xf32>
    %116 = tpu.matmul %115, %4, %cst_27 {dimension_numbers = #tpu.dot_dimension_numbers<[1], [0], [0], [1], [0, 0, 1, 1], [], []>} : vector<8x32xf32>, vector<32x128xf32>, vector<8x128xf32> -> vector<8x128xf32>
    %117 = arith.addf %116, %11 : vector<8x128xf32>
    %118 = arith.negf %117 : vector<8x128xf32>
    %119 = math.exp %118 : vector<8x128xf32>
    %cst_28 = arith.constant 1.000000e+00 : f32
    %120 = vector.broadcast %cst_28 : f32 to vector<8x128xf32>
    %121 = arith.addf %120, %119 : vector<8x128xf32>
    %122 = arith.divf %120, %121 : vector<8x128xf32>
    %123 = math.tanh %117 : vector<8x128xf32>
    %124 = vector.extract_strided_slice %122 {offsets = [0, 0], sizes = [8, 32], strides = [1, 1]} : vector<8x128xf32> to vector<8x32xf32>
    %125 = vector.extract_strided_slice %122 {offsets = [0, 32], sizes = [8, 32], strides = [1, 1]} : vector<8x128xf32> to vector<8x32xf32>
    %126 = vector.extract_strided_slice %123 {offsets = [0, 64], sizes = [8, 32], strides = [1, 1]} : vector<8x128xf32> to vector<8x32xf32>
    %127 = vector.extract_strided_slice %122 {offsets = [0, 96], sizes = [8, 32], strides = [1, 1]} : vector<8x128xf32> to vector<8x32xf32>
    %128 = arith.mulf %125, %113 : vector<8x32xf32>
    %129 = arith.mulf %124, %126 : vector<8x32xf32>
    %130 = arith.addf %128, %129 : vector<8x32xf32>
    %131 = math.tanh %130 : vector<8x32xf32>
    %132 = arith.mulf %127, %131 : vector<8x32xf32>
    %cst_29 = arith.constant dense<0.000000e+00> : vector<8x128xf32>
    %133 = tpu.matmul %132, %4, %cst_29 {dimension_numbers = #tpu.dot_dimension_numbers<[1], [0], [0], [1], [0, 0, 1, 1], [], []>} : vector<8x32xf32>, vector<32x128xf32>, vector<8x128xf32> -> vector<8x128xf32>
    %134 = arith.addf %133, %11 : vector<8x128xf32>
    %135 = arith.negf %134 : vector<8x128xf32>
    %136 = math.exp %135 : vector<8x128xf32>
    %cst_30 = arith.constant 1.000000e+00 : f32
    %137 = vector.broadcast %cst_30 : f32 to vector<8x128xf32>
    %138 = arith.addf %137, %136 : vector<8x128xf32>
    %139 = arith.divf %137, %138 : vector<8x128xf32>
    %140 = math.tanh %134 : vector<8x128xf32>
    %141 = vector.extract_strided_slice %139 {offsets = [0, 0], sizes = [8, 32], strides = [1, 1]} : vector<8x128xf32> to vector<8x32xf32>
    %142 = vector.extract_strided_slice %139 {offsets = [0, 32], sizes = [8, 32], strides = [1, 1]} : vector<8x128xf32> to vector<8x32xf32>
    %143 = vector.extract_strided_slice %140 {offsets = [0, 64], sizes = [8, 32], strides = [1, 1]} : vector<8x128xf32> to vector<8x32xf32>
    %144 = vector.extract_strided_slice %139 {offsets = [0, 96], sizes = [8, 32], strides = [1, 1]} : vector<8x128xf32> to vector<8x32xf32>
    %145 = arith.mulf %142, %130 : vector<8x32xf32>
    %146 = arith.mulf %141, %143 : vector<8x32xf32>
    %147 = arith.addf %145, %146 : vector<8x32xf32>
    %148 = math.tanh %147 : vector<8x32xf32>
    %149 = arith.mulf %144, %148 : vector<8x32xf32>
    %cst_31 = arith.constant dense<0.000000e+00> : vector<8x128xf32>
    %150 = tpu.matmul %149, %5, %cst_31 {dimension_numbers = #tpu.dot_dimension_numbers<[1], [0], [0], [1], [0, 0, 1, 1], [], []>} : vector<8x32xf32>, vector<32x128xf32>, vector<8x128xf32> -> vector<8x128xf32>
    %151 = vector.broadcast %6 : vector<1x128xf32> to vector<8x128xf32>
    %152 = arith.addf %150, %151 : vector<8x128xf32>
    %153 = arith.negf %152 : vector<8x128xf32>
    %154 = math.exp %153 : vector<8x128xf32>
    %cst_32 = arith.constant 1.000000e+00 : f32
    %155 = vector.broadcast %cst_32 : f32 to vector<8x128xf32>
    %156 = arith.addf %155, %154 : vector<8x128xf32>
    %157 = arith.divf %155, %156 : vector<8x128xf32>
    %158 = math.tanh %152 : vector<8x128xf32>
    %159 = vector.extract_strided_slice %157 {offsets = [0, 0], sizes = [8, 32], strides = [1, 1]} : vector<8x128xf32> to vector<8x32xf32>
    %160 = vector.extract_strided_slice %157 {offsets = [0, 32], sizes = [8, 32], strides = [1, 1]} : vector<8x128xf32> to vector<8x32xf32>
    %161 = vector.extract_strided_slice %158 {offsets = [0, 64], sizes = [8, 32], strides = [1, 1]} : vector<8x128xf32> to vector<8x32xf32>
    %162 = vector.extract_strided_slice %157 {offsets = [0, 96], sizes = [8, 32], strides = [1, 1]} : vector<8x128xf32> to vector<8x32xf32>
    %163 = arith.mulf %160, %147 : vector<8x32xf32>
    %164 = arith.mulf %159, %161 : vector<8x32xf32>
    %165 = arith.addf %163, %164 : vector<8x32xf32>
    %166 = math.tanh %165 : vector<8x32xf32>
    %167 = arith.mulf %162, %166 : vector<8x32xf32>
    %cst_33 = arith.constant dense<0.000000e+00> : vector<8x128xf32>
    %168 = tpu.matmul %167, %5, %cst_33 {dimension_numbers = #tpu.dot_dimension_numbers<[1], [0], [0], [1], [0, 0, 1, 1], [], []>} : vector<8x32xf32>, vector<32x128xf32>, vector<8x128xf32> -> vector<8x128xf32>
    %169 = vector.broadcast %6 : vector<1x128xf32> to vector<8x128xf32>
    %170 = arith.addf %168, %169 : vector<8x128xf32>
    %171 = arith.negf %170 : vector<8x128xf32>
    %172 = math.exp %171 : vector<8x128xf32>
    %cst_34 = arith.constant 1.000000e+00 : f32
    %173 = vector.broadcast %cst_34 : f32 to vector<8x128xf32>
    %174 = arith.addf %173, %172 : vector<8x128xf32>
    %175 = arith.divf %173, %174 : vector<8x128xf32>
    %176 = math.tanh %170 : vector<8x128xf32>
    %177 = vector.extract_strided_slice %175 {offsets = [0, 0], sizes = [8, 32], strides = [1, 1]} : vector<8x128xf32> to vector<8x32xf32>
    %178 = vector.extract_strided_slice %175 {offsets = [0, 32], sizes = [8, 32], strides = [1, 1]} : vector<8x128xf32> to vector<8x32xf32>
    %179 = vector.extract_strided_slice %176 {offsets = [0, 64], sizes = [8, 32], strides = [1, 1]} : vector<8x128xf32> to vector<8x32xf32>
    %180 = vector.extract_strided_slice %175 {offsets = [0, 96], sizes = [8, 32], strides = [1, 1]} : vector<8x128xf32> to vector<8x32xf32>
    %181 = arith.mulf %178, %165 : vector<8x32xf32>
    %182 = arith.mulf %177, %179 : vector<8x32xf32>
    %183 = arith.addf %181, %182 : vector<8x32xf32>
    %184 = math.tanh %183 : vector<8x32xf32>
    %185 = arith.mulf %180, %184 : vector<8x32xf32>
    %cst_35 = arith.constant dense<0.000000e+00> : vector<8x128xf32>
    %186 = tpu.matmul %185, %5, %cst_35 {dimension_numbers = #tpu.dot_dimension_numbers<[1], [0], [0], [1], [0, 0, 1, 1], [], []>} : vector<8x32xf32>, vector<32x128xf32>, vector<8x128xf32> -> vector<8x128xf32>
    %187 = vector.broadcast %6 : vector<1x128xf32> to vector<8x128xf32>
    %188 = arith.addf %186, %187 : vector<8x128xf32>
    %189 = arith.negf %188 : vector<8x128xf32>
    %190 = math.exp %189 : vector<8x128xf32>
    %cst_36 = arith.constant 1.000000e+00 : f32
    %191 = vector.broadcast %cst_36 : f32 to vector<8x128xf32>
    %192 = arith.addf %191, %190 : vector<8x128xf32>
    %193 = arith.divf %191, %192 : vector<8x128xf32>
    %194 = math.tanh %188 : vector<8x128xf32>
    %195 = vector.extract_strided_slice %193 {offsets = [0, 0], sizes = [8, 32], strides = [1, 1]} : vector<8x128xf32> to vector<8x32xf32>
    %196 = vector.extract_strided_slice %193 {offsets = [0, 32], sizes = [8, 32], strides = [1, 1]} : vector<8x128xf32> to vector<8x32xf32>
    %197 = vector.extract_strided_slice %194 {offsets = [0, 64], sizes = [8, 32], strides = [1, 1]} : vector<8x128xf32> to vector<8x32xf32>
    %198 = vector.extract_strided_slice %193 {offsets = [0, 96], sizes = [8, 32], strides = [1, 1]} : vector<8x128xf32> to vector<8x32xf32>
    %199 = arith.mulf %196, %183 : vector<8x32xf32>
    %200 = arith.mulf %195, %197 : vector<8x32xf32>
    %201 = arith.addf %199, %200 : vector<8x32xf32>
    %202 = math.tanh %201 : vector<8x32xf32>
    %203 = arith.mulf %198, %202 : vector<8x32xf32>
    %cst_37 = arith.constant dense<0.000000e+00> : vector<8x128xf32>
    %204 = tpu.matmul %203, %5, %cst_37 {dimension_numbers = #tpu.dot_dimension_numbers<[1], [0], [0], [1], [0, 0, 1, 1], [], []>} : vector<8x32xf32>, vector<32x128xf32>, vector<8x128xf32> -> vector<8x128xf32>
    %205 = vector.broadcast %6 : vector<1x128xf32> to vector<8x128xf32>
    %206 = arith.addf %204, %205 : vector<8x128xf32>
    %207 = arith.negf %206 : vector<8x128xf32>
    %208 = math.exp %207 : vector<8x128xf32>
    %cst_38 = arith.constant 1.000000e+00 : f32
    %209 = vector.broadcast %cst_38 : f32 to vector<8x128xf32>
    %210 = arith.addf %209, %208 : vector<8x128xf32>
    %211 = arith.divf %209, %210 : vector<8x128xf32>
    %212 = math.tanh %206 : vector<8x128xf32>
    %213 = vector.extract_strided_slice %211 {offsets = [0, 0], sizes = [8, 32], strides = [1, 1]} : vector<8x128xf32> to vector<8x32xf32>
    %214 = vector.extract_strided_slice %211 {offsets = [0, 32], sizes = [8, 32], strides = [1, 1]} : vector<8x128xf32> to vector<8x32xf32>
    %215 = vector.extract_strided_slice %212 {offsets = [0, 64], sizes = [8, 32], strides = [1, 1]} : vector<8x128xf32> to vector<8x32xf32>
    %216 = vector.extract_strided_slice %211 {offsets = [0, 96], sizes = [8, 32], strides = [1, 1]} : vector<8x128xf32> to vector<8x32xf32>
    %217 = arith.mulf %214, %201 : vector<8x32xf32>
    %218 = arith.mulf %213, %215 : vector<8x32xf32>
    %219 = arith.addf %217, %218 : vector<8x32xf32>
    %220 = math.tanh %219 : vector<8x32xf32>
    %221 = arith.mulf %216, %220 : vector<8x32xf32>
    %222 = tpu.concatenate %167, %185, %203, %221 in 1 : vector<8x32xf32>, vector<8x32xf32>, vector<8x32xf32>, vector<8x32xf32> -> vector<8x128xf32>
    %c0_39 = arith.constant 0 : index
    %c0_40 = arith.constant 0 : index
    %223 = vector.load %arg8[%c0_39, %c0_40] : memref<128x4xf32, #tpu.memory_space<vmem>>, vector<128x4xf32>
    %cst_41 = arith.constant dense<0.000000e+00> : vector<8x4xf32>
    %224 = tpu.matmul %222, %223, %cst_41 {dimension_numbers = #tpu.dot_dimension_numbers<[1], [0], [0], [1], [0, 0, 1, 1], [], []>} : vector<8x128xf32>, vector<128x4xf32>, vector<8x4xf32> -> vector<8x4xf32>
    %c0_42 = arith.constant 0 : index
    %c0_43 = arith.constant 0 : index
    %225 = vector.load %arg9[%c0_42, %c0_43] : memref<1x4xf32, #tpu.memory_space<vmem>>, vector<1x4xf32>
    %226 = vector.broadcast %225 : vector<1x4xf32> to vector<8x4xf32>
    %227 = arith.addf %224, %226 : vector<8x4xf32>
    %228 = vector.broadcast %0 : f32 to vector<8x4xf32>
    %229 = arith.mulf %227, %228 : vector<8x4xf32>
    %c0_44 = arith.constant 0 : index
    %c0_45 = arith.constant 0 : index
    %230 = vector.load %arg10[%c0_44, %c0_45] : memref<8x4xf32, #tpu.memory_space<vmem>>, vector<8x4xf32>
    tpu.vector_store %arg10[%c0_44, %c0_45], %229 {strides = array<i32>} : memref<8x4xf32, #tpu.memory_space<vmem>>, vector<8x4xf32>,
    return
  }
  func.func @transform_0(%arg0: i32) -> (i32, i32) {
    %c0_i32 = arith.constant 0 : i32
    %c0_i32_0 = arith.constant 0 : i32
    %c0_i32_1 = arith.constant 0 : i32
    return %c0_i32, %c0_i32_0 : i32, i32
  }
  func.func @transform_1(%arg0: i32) -> (i32, i32) {
    %c0_i32 = arith.constant 0 : i32
    %c0_i32_0 = arith.constant 0 : i32
    %c0_i32_1 = arith.constant 0 : i32
    return %c0_i32, %c0_i32_0 : i32, i32
  }
  func.func @transform_2(%arg0: i32) -> (i32, i32) {
    %c0_i32 = arith.constant 0 : i32
    %c0_i32_0 = arith.constant 0 : i32
    %c0_i32_1 = arith.constant 0 : i32
    return %c0_i32, %c0_i32_0 : i32, i32
  }
  func.func @transform_3(%arg0: i32) -> (i32, i32) {
    %c0_i32 = arith.constant 0 : i32
    %c0_i32_0 = arith.constant 0 : i32
    %c0_i32_1 = arith.constant 0 : i32
    return %c0_i32, %c0_i32_0 : i32, i32
  }
  func.func @transform_4(%arg0: i32) -> (i32, i32) {
    %c0_i32 = arith.constant 0 : i32
    %c0_i32_0 = arith.constant 0 : i32
    %c0_i32_1 = arith.constant 0 : i32
    return %c0_i32, %c0_i32_0 : i32, i32
  }
  func.func @transform_5(%arg0: i32) -> (i32, i32) {
    %c0_i32 = arith.constant 0 : i32
    %c0_i32_0 = arith.constant 0 : i32
    %c0_i32_1 = arith.constant 0 : i32
    return %c0_i32, %c0_i32_0 : i32, i32
  }
  func.func @transform_6(%arg0: i32) -> (i32, i32) {
    %c0_i32 = arith.constant 0 : i32
    %c0_i32_0 = arith.constant 0 : i32
    %c0_i32_1 = arith.constant 0 : i32
    return %c0_i32, %c0_i32_0 : i32, i32
  }
  func.func @transform_7(%arg0: i32) -> (i32, i32) {
    %c0_i32 = arith.constant 0 : i32
    %c0_i32_0 = arith.constant 0 : i32
    %c0_i32_1 = arith.constant 0 : i32
    return %c0_i32, %c0_i32_0 : i32, i32
  }
  func.func @transform_8(%arg0: i32) -> (i32, i32) {
    %c0_i32 = arith.constant 0 : i32
    %c0_i32_0 = arith.constant 0 : i32
    %c0_i32_1 = arith.constant 0 : i32
    return %c0_i32, %c0_i32_0 : i32, i32
  }
  func.func @transform_9(%arg0: i32) -> (i32, i32) {
    %c0_i32 = arith.constant 0 : i32
    %c0_i32_0 = arith.constant 0 : i32
    %c0_i32_1 = arith.constant 0 : i32
    return %c0_i32, %c0_i32_0 : i32, i32
  }
}

</mosaic_0001>

<bundles_post_ra>
// kernel: tpu_custom_call.1
= control target key start
LH: loop header
LB: loop body
LE: loop exit
PB: predicated region body
PF: predicated region fallthrough
CT: control target
= control target key end

     0   :  { %vm59_vm0 = vcmask 1040384   ;;  %v1917_v0 = vmov 0.0   ;;  %vm1918_vm1 = vmmov 0   ;;  %v1919_v5 = vmov 0.0|0.0   ;;  %s1920_s24 = smov 64   ;;  %s2240_s2 = inlined_call_operand.vmem [shape: f32[1,128], index: 2, kind: input, shape index: {}]   ;;  %s2241_s0 = inlined_call_operand.<no memory space> [shape: f32[1,1], index: 0, kind: input, shape index: {}]   ;;  %s2242_s3 = inlined_call_operand.vmem [shape: f32[32,128], index: 3, kind: input, shape index: {}]   ;;  %s2243_s1 = inlined_call_operand.vmem [shape: f32[8,1], index: 1, kind: input, shape index: {}]   ;;  %s2244_s4 = inlined_call_operand.vmem [shape: f32[1,128], index: 4, kind: input, shape index: {}]   ;;  %s2245_s5 = inlined_call_operand.vmem [shape: f32[32,128], index: 5, kind: input, shape index: {}]   ;;  %s2246_s6 = inlined_call_operand.vmem [shape: f32[1,128], index: 6, kind: input, shape index: {}]   ;;  %s2247_s7 = inlined_call_operand.vmem [shape: f32[128,4], index: 7, kind: input, shape index: {}]   ;;  %s2248_s8 = inlined_call_operand.vmem [shape: f32[1,4], index: 8, kind: input, shape index: {}]   ;;  %s2249_s9 = inlined_call_operand.vmem [shape: f32[8,4], index: 9, kind: output, shape index: {}]  }
   0x1   :  { %1545 = vmatprep.subr.mxu0 %v1917_v0  ;;  %v47_v1 = vld [vmem:[%s2240_s2] sm:$0x1]  ;;  %1547 = vmatprep.mubr.msk.f32.mxu0 %vm1918_vm1, %v1917_v0  ;;  %v35_v2 = vstv %s2241_s0  ;;  %v39_v4 = vld [vmem:[%s2242_s3 + $0x8] sm:$0xff]  ;;  %v40_v7 = vld [vmem:[%s2242_s3 + $0x10] sm:$0xff]  ;;  %vm55_vm2 = vcmask 7168   ;;  %vm133_vm3 = vcmask 261120  }
   0x2   :  { %v38_v3 = vld [vmem:[%s2242_s3] sm:$0xff]  ;;  %1546 = vmatpush3.msk.msra.mxu0 %vm59_vm0, %v47_v1  ;;  %1819 = vrcp.f32 %v35_v2  ;;  %1741 = vmatprep.subr.bf16.mxu1 %v1919_v5  ;;  %v41_v8 = vld [vmem:[%s2242_s3 + $0x18] sm:$0xff]  ;;  %s1922_s2 = smov 96   ;;  %vm1334_vm4 = vcmask 523264   ;;  %vm1336_vm5 = vcmask 785408   ;;  %vm1432_vm6 = vcmask 31744  }
   0x3   :  { %1717 = vmatprep.subr.bf16.mxu0 %v1919_v5  ;;  %v1994_v6 = vpack.c.bf16 %v39_v4, %v38_v3  ;;  %1602 = vmatprep.mubr.msk.f32.mxu1 %vm1918_vm1, %v1917_v0  ;;  %v2006_v9 = vpack.c.bf16 %v41_v8, %v40_v7  ;;  %v34_v10 = vld [vmem:[%s2243_s1] sm:$0xff] }
   0x4   :  { %v1438_v15 = vld [vmem:[%s2244_s4] ss:$0 sm:$0xff]  ;;  %s1921_s4 = smov 32  }
   0x5   :  { %1743 = vmatpush3.bf16.msra.mxu1 %v1994_v6 }
   0x6   :  { %1744 = vmatprep.subr.bf16.mxu1 %v1919_v5 }
   0x9   :  { %1746 = vmatpush3.bf16.msra.mxu1 %v2006_v9 }
   0xa   :  { %1753 = vmatprep.subr.bf16.mxu1 %v1919_v5 }
   0xc   :  { %v1820_v11 = vpop.eup %1819 }
   0xd   :  { %v37_v12 = vmul.f32 %v1820_v11, %v34_v10 }
   0xf   :  { %1548 = vmatmul.mubr.msk.f32.vlgmr.msra.gmra.mrb[0].mxu0 %vm55_vm2, %v37_v12 }
  0x10   :  { %1719 = vmatpush3.bf16.msra.mxu0 %v1994_v6  ;;  %1558 = vmatprep.mubr.msk.f32.mxu0 %vm1918_vm1, %v1917_v0 }
  0x11   :  { %1720 = vmatprep.subr.bf16.mxu0 %v1919_v5 }
  0x14   :  { %1722 = vmatpush3.bf16.msra.mxu0 %v2006_v9 }
  0x15   :  { %1723 = vmatprep.subr.bf16.mxu0 %v1919_v5 }
  0x17   :  { %1559 = vmatmul.mubr.f32.vlgmr.msra.gmra.mrb[2].mxu0 %v1917_v0 }
  0x18   :  { %1725 = vmatpush3.bf16.msra.mxu0 %v1994_v6  ;;  %1569 = vmatprep.mubr.msk.f32.mxu0 %vm1918_vm1, %v1917_v0 }
  0x19   :  { %1726 = vmatprep.subr.bf16.mxu0 %v1919_v5 }
  0x1c   :  { %1728 = vmatpush3.bf16.msra.mxu0 %v2006_v9 }
  0x1d   :  { %1729 = vmatprep.subr.bf16.mxu0 %v1919_v5 }
  0xe2   :  { %v129_v13 = vpop.f32.mrb[0].mxu0 }
  0xe3   :  { %v1549_v14 = vpop.f32.mrb[1].mxu0  ;;  %v2029_v16 = vadd.f32 %v1438_v15, %v129_v13 }
  0xea   :  { %v203_v17 = vpop.f32.mrb[2].mxu0 }
  0xeb   :  { %v204_v18 = vadd.f32 %v203_v17, %v2029_v16  ;;  %v1560_v19 = vpop.f32.mrb[3].mxu0 }
  0xed   :  { %1821 = vtanh.f32 %v204_v18  ;;  %v1441_v21 = vmul.f32 -1.442695, %v204_v18 }
  0xef   :  { %1823 = vpow2.f32 %v1441_v21 }
  0xf7   :  { %v1822_v20 = vpop.eup %1821 }
  0xf8   :  { %216 = vrot.lane.b32.xlu0 %v1822_v20, %s1920_s24 }
  0xf9   :  { %v1824_v22 = vpop.eup %1823 }
  0xfa   :  { %v210_v23 = vadd.f32 1.0, %v1824_v22 }
  0xfc   :  { %1825 = vrcp.f32 %v210_v23 }
 0x106   :  { %v1826_v24 = vpop.eup %1825 }
 0x107   :  { %v214_v27 = vmul.f32 0.0, %v1826_v24 }
 0x16a   :  { %v217_v25 = vpop.permute.xlu0 %216 }
 0x16b   :  { %v219_v26 = vmul.f32 %v1826_v24, %v217_v25 }
 0x16d   :  { %221 = vrot.lane.b32.xlu0 %v219_v26, %s1921_s4 }
 0x1df   :  { %v222_v28 = vpop.permute.xlu0 %221 }
 0x1e0   :  { %v224_v29 = vadd.f32 %v222_v28, %v214_v27 }
 0x1e2   :  { %1827 = vtanh.f32 %v224_v29 }
 0x1ec   :  { %v1828_v30 = vpop.eup %1827 }
 0x1ed   :  { %227 = vrot.lane.b32.xlu1 %v1828_v30, %s1920_s24 }
 0x25f   :  { %v228_v31 = vpop.permute.xlu1 %227 }
 0x260   :  { %v230_v32 = vmul.f32 %v1826_v24, %v228_v31 }
 0x262   :  { %232 = vrot.lane.b32.xlu1 %v230_v32, %s1921_s4 }
 0x2d4   :  { %v233_v33 = vpop.permute.xlu1 %232 }
 0x2d5   :  { %1570 = vmatmul.mubr.msk.f32.vlgmr.msra.gmra.mrb[4].mxu0 %vm133_vm3, %v233_v33 }
 0x2d6   :  { %1731 = vmatpush3.bf16.msra.mxu0 %v1994_v6  ;;  %1580 = vmatprep.mubr.msk.f32.mxu0 %vm1918_vm1, %v1917_v0 }
 0x2d7   :  { %1732 = vmatprep.subr.bf16.mxu0 %v1919_v5 }
 0x2da   :  { %1734 = vmatpush3.bf16.msra.mxu0 %v2006_v9 }
 0x2db   :  { %1735 = vmatprep.subr.bf16.mxu0 %v1919_v5 }
 0x3a8   :  { %v302_v34 = vpop.f32.mrb[4].mxu0 }
 0x3a9   :  { %v303_v35 = vadd.f32 %v302_v34, %v2029_v16  ;;  %v1571_v36 = vpop.f32.mrb[5].mxu0 }
 0x3ab   :  { %1829 = vtanh.f32 %v303_v35  ;;  %v1443_v38 = vmul.f32 -1.442695, %v303_v35 }
 0x3ad   :  { %1831 = vpow2.f32 %v1443_v38 }
 0x3b5   :  { %v1830_v37 = vpop.eup %1829 }
 0x3b6   :  { %315 = vrot.lane.b32.xlu0 %v1830_v37, %s1920_s24 }
 0x3b7   :  { %v1832_v39 = vpop.eup %1831 }
 0x3b8   :  { %v309_v40 = vadd.f32 1.0, %v1832_v39 }
 0x3ba   :  { %1833 = vrcp.f32 %v309_v40 }
 0x3c4   :  { %v1834_v41 = vpop.eup %1833 }
 0x3c5   :  { %v313_v44 = vmul.f32 %v1834_v41, %v224_v29 }
 0x428   :  { %v316_v42 = vpop.permute.xlu0 %315 }
 0x429   :  { %v318_v43 = vmul.f32 %v1834_v41, %v316_v42 }
 0x42b   :  { %320 = vrot.lane.b32.xlu1 %v318_v43, %s1921_s4 }
 0x49d   :  { %v321_v45 = vpop.permute.xlu1 %320 }
 0x49e   :  { %v323_v46 = vadd.f32 %v321_v45, %v313_v44 }
 0x4a0   :  { %1835 = vtanh.f32 %v323_v46 }
 0x4aa   :  { %v1836_v47 = vpop.eup %1835 }
 0x4ab   :  { %326 = vrot.lane.b32.xlu0 %v1836_v47, %s1920_s24 }
 0x51d   :  { %v327_v48 = vpop.permute.xlu0 %326 }
 0x51e   :  { %v329_v49 = vmul.f32 %v1834_v41, %v327_v48 }
 0x520   :  { %331 = vrot.lane.b32.xlu1 %v329_v49, %s1921_s4 }
 0x592   :  { %v332_v50 = vpop.permute.xlu1 %331 }
 0x593   :  { %1581 = vmatmul.mubr.msk.f32.vlgmr.msra.gmra.mrb[6].mxu0 %vm133_vm3, %v332_v50 }
 0x594   :  { %1737 = vmatpush3.bf16.msra.mxu0 %v1994_v6  ;;  %1591 = vmatprep.mubr.msk.f32.mxu0 %vm1918_vm1, %v1917_v0 }
 0x595   :  { %1738 = vmatprep.subr.bf16.mxu0 %v1919_v5 }
 0x598   :  { %1740 = vmatpush3.bf16.msra.mxu0 %v2006_v9 }
 0x599   :  { %1747 = vmatprep.subr.bf16.mxu0 %v1919_v5 }
 0x666   :  { %v401_v51 = vpop.f32.mrb[6].mxu0 }
 0x667   :  { %v402_v52 = vadd.f32 %v401_v51, %v2029_v16  ;;  %v1582_v53 = vpop.f32.mrb[7].mxu0 }
 0x669   :  { %1837 = vtanh.f32 %v402_v52  ;;  %v1445_v55 = vmul.f32 -1.442695, %v402_v52 }
 0x66b   :  { %1839 = vpow2.f32 %v1445_v55 }
 0x673   :  { %v1838_v54 = vpop.eup %1837 }
 0x674   :  { %414 = vrot.lane.b32.xlu0 %v1838_v54, %s1920_s24 }
 0x675   :  { %v1840_v56 = vpop.eup %1839 }
 0x676   :  { %v408_v57 = vadd.f32 1.0, %v1840_v56 }
 0x678   :  { %1841 = vrcp.f32 %v408_v57 }
 0x682   :  { %v1842_v58 = vpop.eup %1841 }
 0x683   :  { %v412_v61 = vmul.f32 %v1842_v58, %v323_v46 }
 0x6e6   :  { %v415_v59 = vpop.permute.xlu0 %414 }
 0x6e7   :  { %v417_v60 = vmul.f32 %v1842_v58, %v415_v59 }
 0x6e9   :  { %419 = vrot.lane.b32.xlu1 %v417_v60, %s1921_s4 }
 0x75b   :  { %v420_v62 = vpop.permute.xlu1 %419 }
 0x75c   :  { %v422_v63 = vadd.f32 %v420_v62, %v412_v61 }
 0x75e   :  { %1843 = vtanh.f32 %v422_v63 }
 0x768   :  { %v1844_v1 = vpop.eup %1843 }
 0x769   :  { %425 = vrot.lane.b32.xlu0 %v1844_v1, %s1920_s24 }
 0x7db   :  { %v426_v3 = vpop.permute.xlu0 %425 }
 0x7dc   :  { %v428_v4 = vmul.f32 %v1842_v58, %v426_v3 }
 0x7de   :  { %430 = vrot.lane.b32.xlu1 %v428_v4, %s1921_s4 }
 0x850   :  { %v431_v7 = vpop.permute.xlu1 %430 }
 0x851   :  { %1592 = vmatmul.mubr.msk.f32.vlgmr.msra.gmra.mrb[8].mxu0 %vm133_vm3, %v431_v7 }
 0x852   :  { %1749 = vmatpush3.bf16.msra.mxu0 %v1994_v6  ;;  %1613 = vmatprep.mubr.msk.f32.mxu0 %vm1918_vm1, %v1917_v0 }
 0x853   :  { %1750 = vmatprep.subr.bf16.mxu0 %v1919_v5 }
 0x856   :  { %1752 = vmatpush3.bf16.msra.mxu0 %v2006_v9 }
 0x857   :  { %1759 = vmatprep.subr.bf16.mxu0 %v1919_v5 }
 0x924   :  { %v500_v8 = vpop.f32.mrb[8].mxu0 }
 0x925   :  { %v501_v10 = vadd.f32 %v500_v8, %v2029_v16  ;;  %v1593_v11 = vpop.f32.mrb[9].mxu0 }
 0x927   :  { %1845 = vtanh.f32 %v501_v10  ;;  %v1447_v13 = vmul.f32 -1.442695, %v501_v10 }
 0x929   :  { %1847 = vpow2.f32 %v1447_v13 }
 0x931   :  { %v1846_v12 = vpop.eup %1845 }
 0x932   :  { %513 = vrot.lane.b32.xlu0 %v1846_v12, %s1920_s24 }
 0x933   :  { %v1848_v14 = vpop.eup %1847 }
 0x934   :  { %v507_v15 = vadd.f32 1.0, %v1848_v14 }
 0x936   :  { %1849 = vrcp.f32 %v507_v15 }
 0x940   :  { %v1850_v17 = vpop.eup %1849 }
 0x941   :  { %v511_v20 = vmul.f32 %v1850_v17, %v422_v63 }
 0x9a4   :  { %v514_v18 = vpop.permute.xlu0 %513 }
 0x9a5   :  { %v516_v19 = vmul.f32 %v1850_v17, %v514_v18 }
 0x9a7   :  { %518 = vrot.lane.b32.xlu1 %v516_v19, %s1921_s4 }
 0xa19   :  { %v519_v21 = vpop.permute.xlu1 %518 }
 0xa1a   :  { %v521_v22 = vadd.f32 %v519_v21, %v511_v20 }
 0xa1c   :  { %1851 = vtanh.f32 %v521_v22 }
 0xa26   :  { %v1852_v23 = vpop.eup %1851 }
 0xa27   :  { %524 = vrot.lane.b32.xlu0 %v1852_v23, %s1920_s24 }
 0xa99   :  { %v525_v24 = vpop.permute.xlu0 %524 }
 0xa9a   :  { %v527_v25 = vmul.f32 %v1850_v17, %v525_v24 }
 0xa9c   :  { %529 = vrot.lane.b32.xlu1 %v527_v25, %s1921_s4 }
 0xb0e   :  { %v530_v26 = vpop.permute.xlu1 %529 }
 0xb0f   :  { %1603 = vmatmul.mubr.msk.f32.vlgmr.msra.gmra.mrb[0].mxu1 %vm133_vm3, %v530_v26 }
 0xb10   :  { %1755 = vmatpush3.bf16.msra.mxu1 %v1994_v6  ;;  %1624 = vmatprep.mubr.msk.f32.mxu1 %vm1918_vm1, %v1917_v0 }
 0xb11   :  { %1756 = vmatprep.subr.bf16.mxu1 %v1919_v5 }
 0xb14   :  { %1758 = vmatpush3.bf16.msra.mxu1 %v2006_v9 }
 0xb15   :  { %1765 = vmatprep.subr.bf16.mxu1 %v1919_v5 }
 0xbe2   :  { %v599_v27 = vpop.f32.mrb[0].mxu1 }
 0xbe3   :  { %v600_v28 = vadd.f32 %v599_v27, %v2029_v16  ;;  %v1604_v29 = vpop.f32.mrb[1].mxu1 }
 0xbe5   :  { %1853 = vtanh.f32 %v600_v28  ;;  %v1449_v31 = vmul.f32 -1.442695, %v600_v28 }
 0xbe7   :  { %1855 = vpow2.f32 %v1449_v31  ;;  %v43_v31 = vld [vmem:[%s2245_s5 + $0x8] sm:$0xff] }
 0xbef   :  { %v1854_v30 = vpop.eup %1853 }
 0xbf0   :  { %612 = vrot.lane.b32.xlu0 %v1854_v30, %s1920_s24 }
 0xbf1   :  { %v1856_v32 = vpop.eup %1855 }
 0xbf2   :  { %v606_v33 = vadd.f32 1.0, %v1856_v32  ;;  %v44_v32 = vld [vmem:[%s2245_s5 + $0x10] sm:$0xff] }
 0xbf4   :  { %1857 = vrcp.f32 %v606_v33 }
 0xbfe   :  { %v1858_v34 = vpop.eup %1857 }
 0xbff   :  { %v610_v37 = vmul.f32 %v1858_v34, %v521_v22 }
 0xc62   :  { %v613_v35 = vpop.permute.xlu0 %612 }
 0xc63   :  { %v615_v36 = vmul.f32 %v1858_v34, %v613_v35 }
 0xc65   :  { %617 = vrot.lane.b32.xlu1 %v615_v36, %s1921_s4 }
 0xcd7   :  { %v618_v38 = vpop.permute.xlu1 %617 }
 0xcd8   :  { %v620_v39 = vadd.f32 %v618_v38, %v610_v37 }
 0xcda   :  { %1859 = vtanh.f32 %v620_v39 }
 0xce4   :  { %v1860_v40 = vpop.eup %1859 }
 0xce5   :  { %623 = vrot.lane.b32.xlu0 %v1860_v40, %s1920_s24  ;;  %v2136_v40 = vld [vmem:[%s2246_s6] ss:$0 sm:$0xff] }
 0xd57   :  { %v624_v41 = vpop.permute.xlu0 %623 }
 0xd58   :  { %v626_v42 = vmul.f32 %v1858_v34, %v624_v41  ;;  %v45_v34 = vld [vmem:[%s2245_s5 + $0x18] sm:$0xff] }
 0xd59   :  { %v1769_v35 = vpack.c.bf16 %v45_v34, %v44_v32 }
 0xd5a   :  { %628 = vrot.lane.b32.xlu1 %v626_v42, %s1921_s4 }
 0xdcc   :  { %v629_v43 = vpop.permute.xlu1 %628 }
 0xdcd   :  { %1614 = vmatmul.mubr.msk.f32.vlgmr.msra.gmra.mrb[10].mxu0 %vm133_vm3, %v629_v43 }
 0xdce   :  { %1761 = vmatpush3.bf16.msra.mxu0 %v1994_v6  ;;  %1635 = vmatprep.mubr.msk.f32.mxu0 %vm1918_vm1, %v1917_v0 }
 0xdcf   :  { %1762 = vmatprep.subr.bf16.mxu0 %v1919_v5 }
 0xdd2   :  { %1764 = vmatpush3.bf16.msra.mxu0 %v2006_v9 }
 0xdd3   :  { %1771 = vmatprep.subr.bf16.mxu0 %v1919_v5 }
 0xea0   :  { %v698_v44 = vpop.f32.mrb[10].mxu0 }
 0xea1   :  { %v699_v45 = vadd.f32 %v698_v44, %v2029_v16  ;;  %v1615_v46 = vpop.f32.mrb[11].mxu0 }
 0xea3   :  { %1861 = vtanh.f32 %v699_v45  ;;  %v1451_v48 = vmul.f32 -1.442695, %v699_v45 }
 0xea5   :  { %1863 = vpow2.f32 %v1451_v48 }
 0xead   :  { %v1862_v47 = vpop.eup %1861 }
 0xeae   :  { %711 = vrot.lane.b32.xlu0 %v1862_v47, %s1920_s24 }
 0xeaf   :  { %v1864_v6 = vpop.eup %1863 }
 0xeb0   :  { %v705_v49 = vadd.f32 1.0, %v1864_v6 }
 0xeb2   :  { %1865 = vrcp.f32 %v705_v49 }
 0xebc   :  { %v1866_v50 = vpop.eup %1865 }
 0xebd   :  { %v709_v9 = vmul.f32 %v1866_v50, %v620_v39 }
 0xf20   :  { %v712_v51 = vpop.permute.xlu0 %711 }
 0xf21   :  { %v714_v52 = vmul.f32 %v1866_v50, %v712_v51 }
 0xf23   :  { %716 = vrot.lane.b32.xlu1 %v714_v52, %s1921_s4 }
 0xf95   :  { %v717_v53 = vpop.permute.xlu1 %716 }
 0xf96   :  { %v719_v54 = vadd.f32 %v717_v53, %v709_v9 }
 0xf98   :  { %1867 = vtanh.f32 %v719_v54 }
 0xfa2   :  { %v1868_v55 = vpop.eup %1867 }
 0xfa3   :  { %722 = vrot.lane.b32.xlu0 %v1868_v55, %s1920_s24 }
0x1015   :  { %v723_v56 = vpop.permute.xlu0 %722 }
0x1016   :  { %v725_v57 = vmul.f32 %v1866_v50, %v723_v56 }
0x1018   :  { %727 = vrot.lane.b32.xlu1 %v725_v57, %s1921_s4 }
0x108a   :  { %v728_v58 = vpop.permute.xlu1 %727 }
0x108b   :  { %1625 = vmatmul.mubr.msk.f32.vlgmr.msra.gmra.mrb[2].mxu1 %vm133_vm3, %v728_v58 }
0x108c   :  { %1646 = vmatprep.mubr.msk.f32.mxu1 %vm1918_vm1, %v1917_v0 }
0x115e   :  { %v797_v59 = vpop.f32.mrb[2].mxu1 }
0x115f   :  { %v798_v60 = vadd.f32 %v797_v59, %v2029_v16  ;;  %v1626_v61 = vpop.f32.mrb[3].mxu1 }
0x1161   :  { %1869 = vtanh.f32 %v798_v60  ;;  %v1453_v63 = vmul.f32 -1.442695, %v798_v60 }
0x1163   :  { %1871 = vpow2.f32 %v1453_v63 }
0x116b   :  { %v1870_v62 = vpop.eup %1869 }
0x116c   :  { %810 = vrot.lane.b32.xlu0 %v1870_v62, %s1920_s24 }
0x116d   :  { %v1872_v1 = vpop.eup %1871 }
0x116e   :  { %v804_v3 = vadd.f32 1.0, %v1872_v1 }
0x1170   :  { %1873 = vrcp.f32 %v804_v3 }
0x117a   :  { %v1874_v4 = vpop.eup %1873 }
0x117b   :  { %v808_v10 = vmul.f32 %v1874_v4, %v719_v54 }
0x11de   :  { %v811_v7 = vpop.permute.xlu0 %810 }
0x11df   :  { %v813_v8 = vmul.f32 %v1874_v4, %v811_v7 }
0x11e1   :  { %815 = vrot.lane.b32.xlu1 %v813_v8, %s1921_s4 }
0x1253   :  { %v816_v11 = vpop.permute.xlu1 %815 }
0x1254   :  { %v818_v12 = vadd.f32 %v816_v11, %v808_v10 }
0x1256   :  { %1875 = vtanh.f32 %v818_v12 }
0x1260   :  { %v1876_v13 = vpop.eup %1875 }
0x1261   :  { %821 = vrot.lane.b32.xlu0 %v1876_v13, %s1920_s24 }
0x12d3   :  { %v822_v14 = vpop.permute.xlu0 %821 }
0x12d4   :  { %v824_v15 = vmul.f32 %v1874_v4, %v822_v14 }
0x12d6   :  { %826 = vrot.lane.b32.xlu1 %v824_v15, %s1921_s4 }
0x1348   :  { %v827_v17 = vpop.permute.xlu1 %826 }
0x1349   :  { %1636 = vmatmul.mubr.msk.f32.vlgmr.msra.gmra.mrb[12].mxu0 %vm133_vm3, %v827_v17 }
0x134a   :  { %1657 = vmatprep.mubr.msk.f32.mxu0 %vm1918_vm1, %v1917_v0 }
0x141c   :  { %v896_v18 = vpop.f32.mrb[12].mxu0 }
0x141d   :  { %v897_v19 = vadd.f32 %v896_v18, %v2029_v16  ;;  %v1637_v20 = vpop.f32.mrb[13].mxu0  ;;  %v42_v16 = vld [vmem:[%s2245_s5] sm:$0xff] }
0x141e   :  { %v1766_v33 = vpack.c.bf16 %v43_v31, %v42_v16 }
0x141f   :  { %1877 = vtanh.f32 %v897_v19  ;;  %v1455_v22 = vmul.f32 -1.442695, %v897_v19 }
0x1420   :  { %1767 = vmatpush3.bf16.msra.mxu1 %v1766_v33  ;;  %1773 = vmatpush3.bf16.msra.mxu0 %v1766_v33 }
0x1421   :  { %1879 = vpow2.f32 %v1455_v22  ;;  %1768 = vmatprep.subr.bf16.mxu1 %v1919_v5  ;;  %1774 = vmatprep.subr.bf16.mxu0 %v1919_v5 }
0x1424   :  { %1770 = vmatpush3.bf16.msra.mxu1 %v1769_v35  ;;  %1776 = vmatpush3.bf16.msra.mxu0 %v1769_v35 }
0x1425   :  { %1777 = vmatprep.subr.bf16.mxu1 %v1919_v5  ;;  %1783 = vmatprep.subr.bf16.mxu0 %v1919_v5 }
0x1429   :  { %v1878_v21 = vpop.eup %1877 }
0x142a   :  { %909 = vrot.lane.b32.xlu0 %v1878_v21, %s1920_s24 }
0x142b   :  { %v1880_v23 = vpop.eup %1879 }
0x142c   :  { %v903_v24 = vadd.f32 1.0, %v1880_v23 }
0x142e   :  { %1881 = vrcp.f32 %v903_v24 }
0x1438   :  { %v1882_v25 = vpop.eup %1881 }
0x1439   :  { %v907_v28 = vmul.f32 %v1882_v25, %v818_v12 }
0x149c   :  { %v910_v26 = vpop.permute.xlu0 %909 }
0x149d   :  { %v912_v27 = vmul.f32 %v1882_v25, %v910_v26 }
0x149f   :  { %914 = vrot.lane.b32.xlu1 %v912_v27, %s1921_s4 }
0x1511   :  { %v915_v29 = vpop.permute.xlu1 %914 }
0x1512   :  { %v917_v30 = vadd.f32 %v915_v29, %v907_v28 }
0x1514   :  { %1883 = vtanh.f32 %v917_v30 }
0x151e   :  { %v1884_v36 = vpop.eup %1883 }
0x151f   :  { %920 = vrot.lane.b32.xlu0 %v1884_v36, %s1920_s24 }
0x1591   :  { %v921_v37 = vpop.permute.xlu0 %920 }
0x1592   :  { %v923_v38 = vmul.f32 %v1882_v25, %v921_v37 }
0x1594   :  { %931 = vrot.lane.b32.xlu1 %v923_v38, %s1921_s4 }
0x1606   :  { %v932_v39 = vpop.permute.xlu1 %931 }
0x1607   :  { %1647 = vmatmul.mubr.msk.f32.vlgmr.msra.gmra.mrb[4].mxu1 %vm133_vm3, %v932_v39 }
0x1608   :  { %1779 = vmatpush3.bf16.msra.mxu1 %v1766_v33  ;;  %1668 = vmatprep.mubr.msk.f32.mxu1 %vm1918_vm1, %v1917_v0 }
0x1609   :  { %1780 = vmatprep.subr.bf16.mxu1 %v1919_v5 }
0x160c   :  { %1782 = vmatpush3.bf16.msra.mxu1 %v1769_v35 }
0x160d   :  { %1789 = vmatprep.subr.bf16.mxu1 %v1919_v5 }
0x16da   :  { %v1001_v41 = vpop.f32.mrb[4].mxu1 }
0x16db   :  { %v1002_v42 = vadd.f32 %v2136_v40, %v1001_v41  ;;  %v1648_v43 = vpop.f32.mrb[5].mxu1  ;;  %v1339_v41 = vld [vmem:[%s2247_s7 + $0x8] sm:$0xff] }
0x16dd   :  { %1885 = vtanh.f32 %v1002_v42  ;;  %v1458_v45 = vmul.f32 -1.442695, %v1002_v42  ;;  %v1340_v42 = vld [vmem:[%s2247_s7 + $0x10] sm:$0xff] }
0x16df   :  { %1887 = vpow2.f32 %v1458_v45 }
0x16e7   :  { %v1886_v44 = vpop.eup %1885 }
0x16e8   :  { %1014 = vrot.lane.b32.xlu0 %v1886_v44, %s1920_s24  ;;  %v1341_v44 = vld [vmem:[%s2247_s7 + $0x18] sm:$0xff] }
0x16e9   :  { %v1888_v46 = vpop.eup %1887  ;;  %v1793_v45 = vpack.c.bf16 %v1341_v44, %v1340_v42 }
0x16ea   :  { %v1008_v47 = vadd.f32 1.0, %v1888_v46  ;;  %v1342_v46 = vld [vmem:[%s2247_s7 + $0x20] sm:$0xff] }
0x16ec   :  { %1889 = vrcp.f32 %v1008_v47  ;;  %v1343_v47 = vld [vmem:[%s2247_s7 + $0x28] sm:$0xff] }
0x16f6   :  { %v1890_v48 = vpop.eup %1889 }
0x16f7   :  { %v1012_v50 = vmul.f32 %v1890_v48, %v917_v30 }
0x175a   :  { %v1015_v6 = vpop.permute.xlu0 %1014 }
0x175b   :  { %v1017_v49 = vmul.f32 %v1890_v48, %v1015_v6  ;;  %v1344_v6 = vld [vmem:[%s2247_s7 + $0x30] sm:$0xff] }
0x175d   :  { %1019 = vrot.lane.b32.xlu1 %v1017_v49, %s1921_s4  ;;  %v1345_v49 = vld [vmem:[%s2247_s7 + $0x38] sm:$0xff] }
0x17cf   :  { %v1020_v51 = vpop.permute.xlu1 %1019 }
0x17d0   :  { %v1022_v52 = vadd.f32 %v1020_v51, %v1012_v50  ;;  %v1799_v50 = vpack.c.bf16 %v1345_v49, %v1344_v6  ;;  %v1346_v51 = vld [vmem:[%s2247_s7 + $0x40] sm:$0xff] }
0x17d2   :  { %1891 = vtanh.f32 %v1022_v52 }
0x17dc   :  { %v1892_v9 = vpop.eup %1891 }
0x17dd   :  { %1025 = vrot.lane.b32.xlu0 %v1892_v9, %s1920_s24 }
0x184f   :  { %v1026_v53 = vpop.permute.xlu0 %1025 }
0x1850   :  { %v1028_v54 = vmul.f32 %v1890_v48, %v1026_v53  ;;  %v1796_v48 = vpack.c.bf16 %v1343_v47, %v1342_v46  ;;  %v1348_v53 = vld [vmem:[%s2247_s7 + $0x50] sm:$0xff] }
0x1852   :  { %1030 = vrot.lane.b32.xlu1 %v1028_v54, %s1921_s4  ;;  %v1349_v54 = vld [vmem:[%s2247_s7 + $0x58] sm:$0xff] }
0x18c4   :  { %v2143_v55 = vpop.permute.xlu1 %1030 }
0x18c5   :  { %1658 = vmatmul.mubr.msk.f32.vlgmr.msra.gmra.mrb[14].mxu0 %vm133_vm3, %v2143_v55 }
0x18c6   :  { %1785 = vmatpush3.bf16.msra.mxu0 %v1766_v33  ;;  %1679 = vmatprep.mubr.msk.f32.mxu0 %vm1918_vm1, %v1917_v0 }
0x18c7   :  { %1786 = vmatprep.subr.bf16.mxu0 %v1919_v5 }
0x18ca   :  { %1788 = vmatpush3.bf16.msra.mxu0 %v1769_v35 }
0x1998   :  { %v1100_v56 = vpop.f32.mrb[14].mxu0 }
0x1999   :  { %v1101_v57 = vadd.f32 %v2136_v40, %v1100_v56  ;;  %v1659_v58 = vpop.f32.mrb[15].mxu0  ;;  %v1805_v56 = vpack.c.bf16 %v1349_v54, %v1348_v53 }
0x199a   :  { %v1351_v58 = vld [vmem:[%s2247_s7 + $0x68] sm:$0xff] }
0x199b   :  { %1893 = vtanh.f32 %v1101_v57  ;;  %v1460_v60 = vmul.f32 -1.442695, %v1101_v57  ;;  %v1350_v57 = vld [vmem:[%s2247_s7 + $0x60] sm:$0xff] }
0x199d   :  { %1895 = vpow2.f32 %v1460_v60 }
0x19a5   :  { %v1894_v59 = vpop.eup %1893 }
0x19a6   :  { %1113 = vrot.lane.b32.xlu0 %v1894_v59, %s1920_s24  ;;  %v1808_v59 = vpack.c.bf16 %v1351_v58, %v1350_v57 }
0x19a7   :  { %v1896_v61 = vpop.eup %1895 }
0x19a8   :  { %v1107_v62 = vadd.f32 1.0, %v1896_v61 }
0x19aa   :  { %1897 = vrcp.f32 %v1107_v62 }
0x19b4   :  { %v1898_v63 = vpop.eup %1897 }
0x19b5   :  { %v1111_v4 = vmul.f32 %v1898_v63, %v1022_v52  ;;  %v1347_v52 = vld [vmem:[%s2247_s7 + $0x48] sm:$0xff] }
0x19b6   :  { %v1802_v9 = vpack.c.bf16 %v1347_v52, %v1346_v51 }
0x1a18   :  { %v1114_v1 = vpop.permute.xlu0 %1113 }
0x1a19   :  { %v1116_v3 = vmul.f32 %v1898_v63, %v1114_v1  ;;  %v1353_v1 = vld [vmem:[%s2247_s7 + $0x78] sm:$0xff] }
0x1a1b   :  { %1118 = vrot.lane.b32.xlu1 %v1116_v3, %s1921_s4 }
0x1a8d   :  { %v1119_v7 = vpop.permute.xlu1 %1118 }
0x1a8e   :  { %v1121_v8 = vadd.f32 %v1119_v7, %v1111_v4 }
0x1a90   :  { %1899 = vtanh.f32 %v1121_v8 }
0x1a9a   :  { %v1900_v10 = vpop.eup %1899 }
0x1a9b   :  { %1124 = vrot.lane.b32.xlu0 %v1900_v10, %s1920_s24 }
0x1b0d   :  { %v1125_v11 = vpop.permute.xlu0 %1124 }
0x1b0e   :  { %v1127_v12 = vmul.f32 %v1898_v63, %v1125_v11  ;;  %v1352_v63 = vld [vmem:[%s2247_s7 + $0x70] sm:$0xff] }
0x1b0f   :  { %v1811_v3 = vpack.c.bf16 %v1353_v1, %v1352_v63 }
0x1b10   :  { %1129 = vrot.lane.b32.xlu1 %v1127_v12, %s1921_s4 }
0x1b82   :  { %v1130_v13 = vpop.permute.xlu1 %1129 }
0x1b83   :  { %1669 = vmatmul.mubr.msk.f32.vlgmr.msra.gmra.mrb[6].mxu1 %vm133_vm3, %v1130_v13 }
0x1b84   :  { %1714 = vmatprep.mubr.msk.f32.mxu1 %vm1918_vm1, %v1917_v0 }
0x1c56   :  { %v1199_v14 = vpop.f32.mrb[6].mxu1 }
0x1c57   :  { %v1200_v15 = vadd.f32 %v2136_v40, %v1199_v14  ;;  %v1670_v17 = vpop.f32.mrb[7].mxu1  ;;  %v1465_v14 = vld [vmem:[%s2248_s8] ss:$0 sm:$0xff] }
0x1c59   :  { %1901 = vtanh.f32 %v1200_v15  ;;  %v1462_v19 = vmul.f32 -1.442695, %v1200_v15 }
0x1c5b   :  { %1903 = vpow2.f32 %v1462_v19 }
0x1c63   :  { %v1902_v18 = vpop.eup %1901 }
0x1c64   :  { %1212 = vrot.lane.b32.xlu0 %v1902_v18, %s1920_s24 }
0x1c65   :  { %v1904_v20 = vpop.eup %1903 }
0x1c66   :  { %v1206_v21 = vadd.f32 1.0, %v1904_v20 }
0x1c68   :  { %1905 = vrcp.f32 %v1206_v21 }
0x1c72   :  { %v1906_v22 = vpop.eup %1905 }
0x1c73   :  { %v1210_v25 = vmul.f32 %v1906_v22, %v1121_v8 }
0x1cd6   :  { %v1213_v23 = vpop.permute.xlu0 %1212 }
0x1cd7   :  { %v1215_v24 = vmul.f32 %v1906_v22, %v1213_v23 }
0x1cd9   :  { %1217 = vrot.lane.b32.xlu1 %v1215_v24, %s1921_s4 }
0x1d4b   :  { %v1218_v0 = vpop.permute.xlu1 %1217 }
0x1d4c   :  { %v1220_v26 = vadd.f32 %v1218_v0, %v1210_v25 }
0x1d4e   :  { %1907 = vtanh.f32 %v1220_v26 }
0x1d58   :  { %v1908_v27 = vpop.eup %1907 }
0x1d59   :  { %1223 = vrot.lane.b32.xlu0 %v1908_v27, %s1920_s24 }
0x1dcb   :  { %v1224_v28 = vpop.permute.xlu0 %1223 }
0x1dcc   :  { %v2162_v29 = vmul.f32 %v1906_v22, %v1224_v28 }
0x1dce   :  { %1228 = vrot.lane.b32.xlu1 %v2162_v29, %s1921_s4 }
0x1e40   :  { %v1229_v30 = vpop.permute.xlu1 %1228 }
0x1e41   :  { %1680 = vmatmul.mubr.msk.f32.vlgmr.msra.gmra.mrb[16].mxu0 %vm133_vm3, %v1229_v30 }
0x1f14   :  { %v1298_v16 = vpop.f32.mrb[16].mxu0 }
0x1f15   :  { %v1299_v31 = vadd.f32 %v2136_v40, %v1298_v16  ;;  %v1681_v32 = vpop.f32.mrb[17].mxu0  ;;  %v1338_v40 = vld [vmem:[%s2247_s7] sm:$0xff] }
0x1f16   :  { %v1790_v43 = vpack.c.bf16 %v1339_v41, %v1338_v40 }
0x1f17   :  { %1909 = vtanh.f32 %v1299_v31  ;;  %v1464_v34 = vmul.f32 -1.442695, %v1299_v31 }
0x1f18   :  { %1791 = vmatpush3.bf16.msra.mxu1 %v1790_v43 }
0x1f19   :  { %1911 = vpow2.f32 %v1464_v34  ;;  %1792 = vmatprep.subr.bf16.mxu1 %v1919_v5 }
0x1f1c   :  { %1794 = vmatpush3.bf16.msra.mxu1 %v1793_v45 }
0x1f1d   :  { %1795 = vmatprep.subr.bf16.mxu1 %v1919_v5 }
0x1f20   :  { %1797 = vmatpush3.bf16.msra.mxu1 %v1796_v48 }
0x1f21   :  { %v1910_v33 = vpop.eup %1909  ;;  %1798 = vmatprep.subr.bf16.mxu1 %v1919_v5 }
0x1f22   :  { %1311 = vrot.lane.b32.xlu0 %v1910_v33, %s1920_s24 }
0x1f23   :  { %v1912_v35 = vpop.eup %1911 }
0x1f24   :  { %v1305_v36 = vadd.f32 1.0, %v1912_v35  ;;  %1800 = vmatpush3.bf16.msra.mxu1 %v1799_v50 }
0x1f25   :  { %1801 = vmatprep.subr.bf16.mxu1 %v1919_v5 }
0x1f26   :  { %1913 = vrcp.f32 %v1305_v36 }
0x1f28   :  { %1803 = vmatpush3.bf16.msra.mxu1 %v1802_v9 }
0x1f29   :  { %1804 = vmatprep.subr.bf16.mxu1 %v1919_v5 }
0x1f2c   :  { %1806 = vmatpush3.bf16.msra.mxu1 %v1805_v56 }
0x1f2d   :  { %1807 = vmatprep.subr.bf16.mxu1 %v1919_v5 }
0x1f30   :  { %v1914_v37 = vpop.eup %1913  ;;  %1809 = vmatpush3.bf16.msra.mxu1 %v1808_v59 }
0x1f31   :  { %1810 = vmatprep.subr.bf16.mxu1 %v1919_v5  ;;  %v1309_v60 = vmul.f32 %v1914_v37, %v1220_v26 }
0x1f34   :  { %1812 = vmatpush3.bf16.msra.mxu1 %v1811_v3 }
0x1f94   :  { %v1312_v38 = vpop.permute.xlu0 %1311 }
0x1f95   :  { %v1314_v39 = vmul.f32 %v1914_v37, %v1312_v38 }
0x1f97   :  { %1316 = vrot.lane.b32.xlu1 %v1314_v39, %s1921_s4 }
0x1f9b   :  { %1327 = vrot.lane.b32.xlu1 %v1127_v12, %s1920_s24 }
0x2009   :  { %v1317_v61 = vpop.permute.xlu1 %1316 }
0x200a   :  { %v1319_v62 = vadd.f32 %v1317_v61, %v1309_v60 }
0x200c   :  { %1915 = vtanh.f32 %v1319_v62 }
0x200d   :  { %v1328_v7 = vpop.permute.xlu1 %1327 }
0x200e   :  { %v1333_v8 = vsel %vm133_vm3, %v2143_v55, %v1328_v7 }
0x2016   :  { %v1916_v4 = vpop.eup %1915 }
0x2017   :  { %1322 = vrot.lane.b32.xlu0 %v1916_v4, %s1920_s24 }
0x201b   :  { %1330 = vrot.lane.b32.xlu0 %v2162_v29, %s1922_s2 }
0x2089   :  { %v1323_v5 = vpop.permute.xlu0 %1322 }
0x208a   :  { %v1325_v10 = vmul.f32 %v1914_v37, %v1323_v5 }
0x208d   :  { %v1331_v11 = vpop.permute.xlu0 %1330 }
0x208e   :  { %v1335_v12 = vsel %vm1334_vm4, %v1333_v8, %v1331_v11 }
0x208f   :  { %v1337_v13 = vsel %vm1336_vm5, %v1335_v12, %v1325_v10 }
0x2090   :  { %1715 = vmatmul.mubr.f32.vlgmr.msra.gmra.mrb[8].mxu1 %v1337_v13 }
0x2163   :  { %v1427_v15 = vpop.f32.mrb[8].mxu1 }
0x2164   :  { %v1428_v17 = vadd.f32 %v1465_v14, %v1427_v15  ;;  %v1716_v18 = vpop.f32.mrb[9].mxu1 }
0x2166   :  { %v1431_v19 = vmul.f32 %v1428_v17, %v35_v2 }
0x2168   :  { %1433 = vst.msk [vmem:[%s2249_s9] sm:$0xff] %vm1432_vm6, %v1431_v19 }

</bundles_post_ra>
